<compile_context>
chip_gen: v5e
topology: v5e:2x2
jax: 0.10.0
libtpu: 0.0.40
codegen_flags: <defaults>
</compile_context>

<pallas_src>
import functools

import jax
import jax.numpy as jnp
from jax.experimental import pallas as pl
from jax.experimental.pallas import tpu as pltpu


def _ceil_div(a, b):
    return -(-a // b)


def _smooth_l1_sum_kernel(x_ref, t_ref, out_ref, acc_ref, *, inv_denom):
    i = pl.program_id(0)

    @pl.when(i == 0)
    def _():
        acc_ref[...] = jnp.zeros_like(acc_ref)

    # Elementwise SmoothL1 (beta = 1.0, PyTorch default), computed in f32.
    d = x_ref[...].astype(jnp.float32) - t_ref[...].astype(jnp.float32)
    ad = jnp.abs(d)
    loss = jnp.where(ad < 1.0, 0.5 * d * d, ad - 0.5)

    # Elementwise vector accumulation (VPU only; no per-step cross-lane reduce).
    acc_ref[...] += loss

    @pl.when(i == pl.num_programs(0) - 1)
    def _():
        total = jnp.sum(acc_ref[...], axis=1, keepdims=True)   # (block_rows, 1)
        total = jnp.sum(total, axis=0, keepdims=True)          # (1, 1)
        out_ref[...] = total * inv_denom


def smooth_l1_loss_weighted(x, target, mask=None, *, cols=512, max_block_rows=1024):
    """Forward of SmoothL1LossWeighted(weighted=False).

    x, target: [N, C, H, W] float. mask: optional [N, H, W] (its values do not
    affect the result on the unweighted / to_ignore=None path; only the pixel
    count N*H*W matters, and that equals x.size // C).
    """
    del mask  # values irrelevant on this path (weight_mask == ones)

    C = x.shape[1]
    E = int(x.size)                     # total elements N*C*H*W
    n_pixels = E // C                   # == temp.numel() == sum(weight_mask)

    # Flat, contiguous view -> lane-dense [rows, cols] layout (free reshape).
    rows = _ceil_div(E, cols)
    n_blocks = max(1, _ceil_div(rows, max_block_rows))
    if n_blocks == 1:
        block_rows = rows               # full-extent block: no (8,128) constraint
    else:
        block_rows = _ceil_div(_ceil_div(rows, n_blocks), 8) * 8
    rows_pad = n_blocks * block_rows
    E_pad = rows_pad * cols

    xf = x.reshape(-1)
    tf = target.reshape(-1)
    if E_pad != E:
        # Zero-pad both inputs: smooth_l1(0, 0) == 0, contributes nothing.
        xf = jnp.pad(xf, (0, E_pad - E))
        tf = jnp.pad(tf, (0, E_pad - E))
    x2 = xf.reshape(rows_pad, cols)
    t2 = tf.reshape(rows_pad, cols)

    kernel = functools.partial(_smooth_l1_sum_kernel,
                               inv_denom=float(1.0 / n_pixels))

    out = pl.pallas_call(
        kernel,
        out_shape=jax.ShapeDtypeStruct((1, 1), jnp.float32),
        grid_spec=pltpu.PrefetchScalarGridSpec(
            num_scalar_prefetch=0,
            grid=(n_blocks,),
            in_specs=[
                pl.BlockSpec((block_rows, cols), lambda i: (i, 0)),
                pl.BlockSpec((block_rows, cols), lambda i: (i, 0)),
            ],
            out_specs=pl.BlockSpec((1, 1), lambda i: (0, 0)),
            scratch_shapes=[
                pltpu.VMEM((block_rows, cols), jnp.float32),  # running partial sums
            ],
        ),
        compiler_params=pltpu.CompilerParams(
            dimension_semantics=(pltpu.ARBITRARY,)),
    )(x2, t2)
    return out[0, 0]


def _reference(x, target):
    # Pure-JAX reference of the PyTorch forward (weighted=False).
    d = (x - target).astype(jnp.float32)
    ad = jnp.abs(d)
    per = jnp.where(ad < 1.0, 0.5 * d * d, ad - 0.5)
    temp = per.sum(axis=1)                      # sum over channel dim
    return jnp.sum(temp) / temp.size            # == sum / (N*H*W)


if __name__ == "__main__":
    key = jax.random.PRNGKey(0)
    k1, k2, k3 = jax.random.split(key, 3)

    N, C, H, W = 2, 4, 16, 16
    x = jax.random.normal(k1, (N, C, H, W), dtype=jnp.float32)
    target = jax.random.normal(k2, (N, C, H, W), dtype=jnp.float32)
    mask = jax.random.randint(k3, (N, H, W), 0, 3, dtype=jnp.int32)

    loss_masked = smooth_l1_loss_weighted(x, target, mask)
    loss_masked = jax.block_until_ready(loss_masked)
    loss_nomask = smooth_l1_loss_weighted(x, target, None)
    loss_nomask = jax.block_until_ready(loss_nomask)

    ref = _reference(x, target)
    assert jnp.allclose(loss_masked, ref, rtol=1e-5, atol=1e-6), (loss_masked, ref)
    assert jnp.allclose(loss_nomask, ref, rtol=1e-5, atol=1e-6), (loss_nomask, ref)
    print("KERNEL_OK")
</pallas_src>

<mosaic_0001>
module attributes {stable_mosaic.version = 11 : i64} {
  func.func @_smooth_l1_sum_kernel(%arg0: i32, %arg1: memref<4x512xf32, #tpu.memory_space<vmem>>, %arg2: memref<4x512xf32, #tpu.memory_space<vmem>>, %arg3: memref<1x1xf32, #tpu.memory_space<vmem>>, %arg4: memref<4x512xf32, #tpu.memory_space<vmem>>) attributes {dimension_semantics = [#tpu.dimension_semantics<arbitrary>], iteration_bounds = array<i64: 1>, scalar_prefetch = 0 : i64, scratch_operands = 1 : i64, tpu.core_type = #tpu.core_type<tc>, window_params = [{transform_indices = @transform_0, window_bounds = array<i64: 4, 512>}, {transform_indices = @transform_1, window_bounds = array<i64: 4, 512>}, {pipeline_mode = #tpu.pipeline_mode<synchronous>, transform_indices = @transform_2, window_bounds = array<i64: 1, 1>}]} {
    %c0_i32 = arith.constant 0 : i32
    %0 = arith.cmpi eq, %arg0, %c0_i32 : i32
    %1 = arith.extui %0 : i1 to i32
    %c0_i32_0 = arith.constant 0 : i32
    %2 = arith.cmpi ne, %1, %c0_i32_0 : i32
    scf.if %2 {
      %cst_12 = arith.constant 0.000000e+00 : f32
      %21 = vector.broadcast %cst_12 : f32 to vector<4x512xf32>
      %c0_13 = arith.constant 0 : index
      %c0_14 = arith.constant 0 : index
      %22 = vector.load %arg4[%c0_13, %c0_14] : memref<4x512xf32, #tpu.memory_space<vmem>>, vector<4x512xf32>
      tpu.vector_store %arg4[%c0_13, %c0_14], %21 {strides = array<i32>} : memref<4x512xf32, #tpu.memory_space<vmem>>, vector<4x512xf32>,
    } else {
    }
    %c0 = arith.constant 0 : index
    %c0_1 = arith.constant 0 : index
    %3 = vector.load %arg1[%c0, %c0_1] : memref<4x512xf32, #tpu.memory_space<vmem>>, vector<4x512xf32>
    %c0_2 = arith.constant 0 : index
    %c0_3 = arith.constant 0 : index
    %4 = vector.load %arg2[%c0_2, %c0_3] : memref<4x512xf32, #tpu.memory_space<vmem>>, vector<4x512xf32>
    %5 = arith.subf %3, %4 : vector<4x512xf32>
    %6 = math.absf %5 : vector<4x512xf32>
    %cst = arith.constant 1.000000e+00 : f32
    %7 = vector.broadcast %cst : f32 to vector<4x512xf32>
    %8 = arith.cmpf olt, %6, %7 : vector<4x512xf32>
    %cst_4 = arith.constant 5.000000e-01 : f32
    %9 = vector.broadcast %cst_4 : f32 to vector<4x512xf32>
    %10 = arith.mulf %9, %5 : vector<4x512xf32>
    %11 = arith.mulf %10, %5 : vector<4x512xf32>
    %cst_5 = arith.constant 5.000000e-01 : f32
    %12 = vector.broadcast %cst_5 : f32 to vector<4x512xf32>
    %13 = arith.subf %6, %12 : vector<4x512xf32>
    %14 = arith.select %8, %11, %13 : vector<4x512xi1>, vector<4x512xf32>
    %c0_6 = arith.constant 0 : index
    %c0_7 = arith.constant 0 : index
    %15 = vector.load %arg4[%c0_6, %c0_7] : memref<4x512xf32, #tpu.memory_space<vmem>>, vector<4x512xf32>
    %16 = arith.addf %15, %14 : vector<4x512xf32>
    %c0_8 = arith.constant 0 : index
    %c0_9 = arith.constant 0 : index
    %17 = vector.load %arg4[%c0_8, %c0_9] : memref<4x512xf32, #tpu.memory_space<vmem>>, vector<4x512xf32>
    tpu.vector_store %arg4[%c0_8, %c0_9], %16 {strides = array<i32>} : memref<4x512xf32, #tpu.memory_space<vmem>>, vector<4x512xf32>,
    %c0_i32_10 = arith.constant 0 : i32
    %18 = arith.cmpi eq, %arg0, %c0_i32_10 : i32
    %19 = arith.extui %18 : i1 to i32
    %c0_i32_11 = arith.constant 0 : i32
    %20 = arith.cmpi ne, %19, %c0_i32_11 : i32
    scf.if %20 {
      %c0_12 = arith.constant 0 : index
      %c0_13 = arith.constant 0 : index
      %21 = vector.load %arg4[%c0_12, %c0_13] : memref<4x512xf32, #tpu.memory_space<vmem>>, vector<4x512xf32>
      %cst_14 = arith.constant dense<0.000000e+00> : vector<4xf32>
      %22 = vector.multi_reduction <add>, %21, %cst_14 [1] : vector<4x512xf32> to vector<4xf32>
      %23 = vector.shape_cast %22 : vector<4xf32> to vector<4x1xf32>
      %cst_15 = arith.constant dense<0.000000e+00> : vector<1xf32>
      %24 = vector.multi_reduction <add>, %23, %cst_15 [0] : vector<4x1xf32> to vector<1xf32>
      %25 = vector.shape_cast %24 : vector<1xf32> to vector<1x1xf32>
      %cst_16 = arith.constant 0.001953125 : f32
      %26 = vector.broadcast %cst_16 : f32 to vector<1x1xf32>
      %27 = arith.mulf %25, %26 : vector<1x1xf32>
      %c0_17 = arith.constant 0 : index
      %c0_18 = arith.constant 0 : index
      %28 = vector.load %arg3[%c0_17, %c0_18] : memref<1x1xf32, #tpu.memory_space<vmem>>, vector<1x1xf32>
      tpu.vector_store %arg3[%c0_17, %c0_18], %27 {strides = array<i32>} : memref<1x1xf32, #tpu.memory_space<vmem>>, vector<1x1xf32>,
    } else {
    }
    return
  }
  func.func @transform_0(%arg0: i32) -> (i32, i32) {
    %c0_i32 = arith.constant 0 : i32
    %c0_i32_0 = arith.constant 0 : i32
    return %arg0, %c0_i32 : i32, i32
  }
  func.func @transform_1(%arg0: i32) -> (i32, i32) {
    %c0_i32 = arith.constant 0 : i32
    %c0_i32_0 = arith.constant 0 : i32
    return %arg0, %c0_i32 : i32, i32
  }
  func.func @transform_2(%arg0: i32) -> (i32, i32) {
    %c0_i32 = arith.constant 0 : i32
    %c0_i32_0 = arith.constant 0 : i32
    %c0_i32_1 = arith.constant 0 : i32
    return %c0_i32, %c0_i32_0 : i32, i32
  }
}

</mosaic_0001>

<bundles_post_ra>
// kernel: tpu_custom_call.1
= control target key start
LH: loop header
LB: loop body
LE: loop exit
PB: predicated region body
PF: predicated region fallthrough
CT: control target
= control target key end

     0   :  { %7 = vsyncpa [#allocation4], 0  ;;  %s236_s0 = inlined_call_operand.hbm [shape: f32[4,512], index: 0, kind: input, shape index: {}]   ;;  %s237_s1 = inlined_call_operand.hbm [shape: f32[4,512], index: 1, kind: input, shape index: {}]   ;;  %s238_s2 = inlined_call_operand.hbm [shape: f32[1,1], index: 2, kind: output, shape index: {}]  }
   0x1   :  { %8 = vsyncpa [#allocation7], 0 }
   0x2   :  { %9 = vsyncpa [#allocation5], 0  ;;  %s15_s11 = sshll.u32 %s236_s0, 4  ;;  %s209_s12 = smov [#allocation3]   ;;  %s16_s11 = int_to_ptr.hbm [resolvable:$true] %s15_s11 }
   0x3   :  { %s17_s13 = sshll.u32 %s209_s12, 4  ;;  %s26_s16 = sshll.u32 %s237_s1, 4  ;;  %s18_s13 = int_to_ptr.vmem [resolvable:$true] %s17_s13  ;;  %s27_s16 = int_to_ptr.hbm [resolvable:$true] %s26_s16 }
   0x4   :  { %20 = dma.hbm_to_vmem [thread:$0]  %s16_s11, 256, %s18_s13, [#allocation4]  }
   0x5   :  { %s210_s17 = smov [#allocation6]  }
   0x6   :  { %s28_s18 = sshll.u32 %s210_s17, 4  ;;  %s29_s18 = int_to_ptr.vmem [resolvable:$true] %s28_s18 }
   0x7   :  { %31 = dma.hbm_to_vmem [thread:$0]  %s27_s16, 256, %s29_s18, [#allocation7]  }
   0x8   :  { %203 = dma.done.wait [#allocation4], 256  }
   0x9   :  { %204 = vsyncadd [#allocation4], 4294967040 }
   0xa   :  { %205 = dma.done.wait [#allocation7], 256  }
   0xb   :  { %206 = vsyncadd [#allocation7], 4294967040  ;;  %v46_v0 = vld [vmem:[#allocation3] sm:$0xff]  ;;  %v48_v1 = vld [vmem:[#allocation6] sm:$0xff]  ;;  %vm88_vm2 = vcmask 1043456   ;;  %s211_s0 = smov [#allocation8]  }
   0xc   :  { %v47_v2 = vld [vmem:[#allocation3 + $0x8] sm:$0xff]  ;;  %v50_v3 = vsub.f32 %v46_v0, %v48_v1  ;;  %v49_v4 = vld [vmem:[#allocation6 + $0x8] sm:$0xff]  ;;  %s113_s1 = sshll.u32 %s211_s0, 4  ;;  %s115_s21 = sshll.u32 %s238_s2, 4  ;;  %vm106_vm3 = vcmask 0   ;;  %s114_s1 = int_to_ptr.vmem [resolvable:$true] %s113_s1  ;;  %s116_s21 = int_to_ptr.hbm [resolvable:$true] %s115_s21 }
   0xd   :  { %v51_v5 = vsub.f32 %v47_v2, %v49_v4 }
   0xe   :  { %v52_v6 = vand.u32 2147483647, %v50_v3  ;;  %v56_v7 = vmul.f32 0.5, %v50_v3 }
   0xf   :  { %v53_v8 = vand.u32 2147483647, %v51_v5  ;;  %v57_v9 = vmul.f32 0.5, %v51_v5 }
  0x10   :  { %vm54_vm0 = vcmp.lt.f32.partialorder %v52_v6, 1.0  ;;  %v58_v10 = vmul.f32 %v56_v7, %v50_v3  ;;  %v126_v11 = vadd.f32 -0.5, %v52_v6 }
  0x11   :  { %vm55_vm1 = vcmp.lt.f32.partialorder %v53_v8, 1.0  ;;  %v59_v12 = vmul.f32 %v57_v9, %v51_v5  ;;  %v127_v13 = vadd.f32 -0.5, %v53_v8 }
  0x12   :  { %v62_v14 = vsel %vm54_vm0, %v58_v10, %v126_v11 }
  0x13   :  { %77 = vst [vmem:[#allocation1] ss:$2 sm:$0xff] %v62_v14  ;;  %v63_v15 = vsel %vm55_vm1, %v59_v12, %v127_v13 }
  0x14   :  { %79 = vst [vmem:[#allocation1 + $0x10] ss:$2 sm:$0xff] %v63_v15 }
  0x1a   :  { %v80_v16 = vld.sshfl [vmem:[#allocation1] sm:$0xff pattern:$0x75316420]  ;;  %v81_v17 = vld.sshfl [vmem:[#allocation1 + $0x8] sm:$0xff pattern:$0x75316420] }
  0x1b   :  { %v82_v18 = vld.sshfl [vmem:[#allocation1 + $0x10] sm:$0xff pattern:$0x75316420]  ;;  %v83_v19 = vld.sshfl [vmem:[#allocation1 + $0x18] sm:$0xff pattern:$0x75316420] }
  0x1c   :  { %v89_v20 = vsel %vm88_vm2, %v80_v16, 0.0  ;;  %v90_v21 = vsel %vm88_vm2, %v81_v17, 0.0  ;;  %v92_v22 = vsel %vm88_vm2, %v82_v18, 0.0  ;;  %v94_v24 = vsel %vm88_vm2, %v83_v19, 0.0 }
  0x1d   :  { %v91_v23 = vadd.f32 %v90_v21, %v89_v20 }
  0x1f   :  { %v93_v25 = vadd.f32 %v92_v22, %v91_v23 }
  0x21   :  { %v95_v26 = vadd.f32 %v94_v24, %v93_v25 }
  0x23   :  { %96 = vadd.xlane.f32.xlu0 %v95_v26 }
  0x96   :  { %v97_v27 = vpop.xlane.xlu0 %96 }
  0x97   :  { %v98_v28 = vsel %vm88_vm2, %v97_v27, 0.0 }
  0x98   :  { %v99_v29 = vrot.slane %v98_v28, 4 }
  0x9a   :  { %v100_v30 = vadd.f32 %v99_v29, %v98_v28 }
  0x9c   :  { %v101_v31 = vrot.slane %v100_v30, 2 }
  0x9e   :  { %v102_v32 = vadd.f32 %v101_v31, %v100_v30 }
  0xa0   :  { %v103_v33 = vrot.slane %v102_v32, 1 }
  0xa2   :  { %v104_v34 = vadd.f32 %v103_v33, %v102_v32 }
  0xa4   :  { %v105_v35 = vmul.f32 0.001953125, %v104_v34 }
  0xa6   :  { %107 = vst.msk [vmem:[#allocation8] sm:$0x1] %vm106_vm3, %v105_v35 }
  0xa7   :  { %118 = dma.vmem_to_hbm [thread:$0]  %s114_s1, 16, %s116_s21, [#allocation5]  }
  0xa8   :  { %207 = dma.done.wait [#allocation5], 16  }
  0xa9   :  { %208 = vsyncadd [#allocation5], 4294967280 }
  0xaa   :  { %123 = vsyncpa [#allocation4], 1 }
  0xab   :  { %124 = vsyncpa [#allocation7], 1 }
  0xac   :  { %125 = vsyncpa [#allocation5], 1 }

</bundles_post_ra>
